<compile_context>
chip_gen: v6e
topology: v6e:2x2x1
jax: 0.10.0
libtpu: 0.0.40
codegen_flags: <defaults>
</compile_context>

<pallas_src>
import functools

import jax
import jax.numpy as jnp
from jax.experimental import pallas as pl
from jax.experimental.pallas import tpu as pltpu


def _round_up(x, m):
    return (x + m - 1) // m * m


# ----------------------------------------------------------------------------- #
# Fused (x @ W + b) -> ReLU Pallas kernel                                        #
# ----------------------------------------------------------------------------- #
def _linear_relu_kernel(do_relu, x_ref, w_ref, b_ref, o_ref):
    # bf16 operands, f32 accumulation on the MXU
    acc = jnp.dot(x_ref[...], w_ref[...], preferred_element_type=jnp.float32)
    acc = acc + b_ref[...]                      # per-output-feature bias
    if do_relu:
        acc = jnp.maximum(acc, 0.0)
    o_ref[...] = acc.astype(o_ref.dtype)


def linear_relu(x, w, b, relu=True):
    """y = maybe_relu(x @ w.T + b), fused in one Pallas kernel.

    x: (M, K) f32 activations
    w: (N, K) f32 weight (PyTorch nn.Linear layout)
    b: (N,)   f32 bias
    returns (M, N) f32
    """
    M, K = x.shape
    N = w.shape[0]

    # Lane-dense output: pad N up to a multiple of 128 with zero columns.
    Npad = _round_up(N, 128)
    wmat = jnp.zeros((K, Npad), jnp.bfloat16).at[:, :N].set(
        w.T.astype(jnp.bfloat16))
    bias = jnp.zeros((1, Npad), jnp.float32).at[:, :N].set(
        b.reshape(1, N).astype(jnp.float32))

    # M tiling: small batches run as one full-array block (no host-side pad);
    # large batches tile M in 128-row blocks.
    if M <= 256:
        tm, Mpad = M, M
        xp = x.astype(jnp.bfloat16)
    else:
        tm = 128
        Mpad = _round_up(M, tm)
        xp = jnp.pad(x, ((0, Mpad - M), (0, 0))).astype(jnp.bfloat16)

    kernel = functools.partial(_linear_relu_kernel, relu)
    out = pl.pallas_call(
        kernel,
        out_shape=jax.ShapeDtypeStruct((Mpad, Npad), jnp.float32),
        grid=(Mpad // tm,),
        in_specs=[
            pl.BlockSpec((tm, K), lambda i: (i, 0)),      # activations (bf16)
            pl.BlockSpec((K, Npad), lambda i: (0, 0)),    # weight (bf16)
            pl.BlockSpec((1, Npad), lambda i: (0, 0)),    # bias (f32)
        ],
        out_specs=pl.BlockSpec((tm, Npad), lambda i: (i, 0)),
        compiler_params=pltpu.CompilerParams(
            dimension_semantics=("parallel",),
        ),
    )(xp, wmat, bias)
    return out[:M, :N]


# ----------------------------------------------------------------------------- #
# FC_3 module: Linear(512, 64) -> ReLU -> Dropout(0.1)                           #
# ----------------------------------------------------------------------------- #
def make_fc3_params(key, in_features=512, out_features=64):
    # PyTorch nn.Linear default init: U(-k, k), k = 1/sqrt(fan_in)
    k = 1.0 / (in_features ** 0.5)
    kw, kb = jax.random.split(key)
    w = jax.random.uniform(kw, (out_features, in_features), jnp.float32, -k, k)
    b = jax.random.uniform(kb, (out_features,), jnp.float32, -k, k)
    return {"w": w, "b": b}


def fc3_forward(x, params):
    x = linear_relu(x, params["w"], params["b"], relu=True)
    # TODO(synk): Dropout(p=0.1) is identity in eval mode; not implemented as a kernel.
    return x


if __name__ == "__main__":
    key = jax.random.PRNGKey(0)
    pkey, xkey = jax.random.split(key)
    expansion = 1                                     # BasicBlock.expansion
    params = make_fc3_params(pkey, in_features=512 * expansion, out_features=64)
    x = jax.random.normal(xkey, (2, 512 * expansion), jnp.float32)
    out = fc3_forward(x, params)
    out = jax.block_until_ready(out)
    assert out.shape == (2, 64) and out.dtype == jnp.float32
    assert bool(jnp.all(out >= 0.0))                  # ReLU epilogue applied
    print("KERNEL_OK")
</pallas_src>

<mosaic_0001>
module attributes {stable_mosaic.version = 11 : i64} {
  func.func @_linear_relu_kernel(%arg0: i32, %arg1: memref<2x512xbf16, #tpu.memory_space<vmem>>, %arg2: memref<512x128xbf16, #tpu.memory_space<vmem>>, %arg3: memref<1x128xf32, #tpu.memory_space<vmem>>, %arg4: memref<2x128xf32, #tpu.memory_space<vmem>>) attributes {dimension_semantics = [#tpu.dimension_semantics<parallel>], iteration_bounds = array<i64: 1>, scalar_prefetch = 0 : i64, scratch_operands = 0 : i64, tpu.core_type = #tpu.core_type<tc>, window_params = [{transform_indices = @transform_0, window_bounds = array<i64: 2, 512>}, {pipeline_mode = #tpu.pipeline_mode<synchronous>, transform_indices = @transform_1, window_bounds = array<i64: 512, 128>}, {pipeline_mode = #tpu.pipeline_mode<synchronous>, transform_indices = @transform_2, window_bounds = array<i64: 1, 128>}, {transform_indices = @transform_3, window_bounds = array<i64: 2, 128>}]} {
    %c0 = arith.constant 0 : index
    %c0_0 = arith.constant 0 : index
    %0 = vector.load %arg1[%c0, %c0_0] : memref<2x512xbf16, #tpu.memory_space<vmem>>, vector<2x512xbf16>
    %c0_1 = arith.constant 0 : index
    %c0_2 = arith.constant 0 : index
    %1 = vector.load %arg2[%c0_1, %c0_2] : memref<512x128xbf16, #tpu.memory_space<vmem>>, vector<512x128xbf16>
    %cst = arith.constant dense<0.000000e+00> : vector<2x128xf32>
    %2 = tpu.matmul %0, %1, %cst {dimension_numbers = #tpu.dot_dimension_numbers<[1], [0], [0], [1], [0, 0, 1, 1], [], []>} : vector<2x512xbf16>, vector<512x128xbf16>, vector<2x128xf32> -> vector<2x128xf32>
    %c0_3 = arith.constant 0 : index
    %c0_4 = arith.constant 0 : index
    %3 = vector.load %arg3[%c0_3, %c0_4] : memref<1x128xf32, #tpu.memory_space<vmem>>, vector<1x128xf32>
    %4 = vector.broadcast %3 : vector<1x128xf32> to vector<2x128xf32>
    %5 = arith.addf %2, %4 : vector<2x128xf32>
    %cst_5 = arith.constant 0.000000e+00 : f32
    %6 = vector.broadcast %cst_5 : f32 to vector<2x128xf32>
    %7 = arith.maximumf %5, %6 : vector<2x128xf32>
    %c0_6 = arith.constant 0 : index
    %c0_7 = arith.constant 0 : index
    %8 = vector.load %arg4[%c0_6, %c0_7] : memref<2x128xf32, #tpu.memory_space<vmem>>, vector<2x128xf32>
    tpu.vector_store %arg4[%c0_6, %c0_7], %7 {strides = array<i32>} : memref<2x128xf32, #tpu.memory_space<vmem>>, vector<2x128xf32>,
    return
  }
  func.func @transform_0(%arg0: i32) -> (i32, i32) {
    %c0_i32 = arith.constant 0 : i32
    %c0_i32_0 = arith.constant 0 : i32
    return %arg0, %c0_i32 : i32, i32
  }
  func.func @transform_1(%arg0: i32) -> (i32, i32) {
    %c0_i32 = arith.constant 0 : i32
    %c0_i32_0 = arith.constant 0 : i32
    %c0_i32_1 = arith.constant 0 : i32
    return %c0_i32, %c0_i32_0 : i32, i32
  }
  func.func @transform_2(%arg0: i32) -> (i32, i32) {
    %c0_i32 = arith.constant 0 : i32
    %c0_i32_0 = arith.constant 0 : i32
    %c0_i32_1 = arith.constant 0 : i32
    return %c0_i32, %c0_i32_0 : i32, i32
  }
  func.func @transform_3(%arg0: i32) -> (i32, i32) {
    %c0_i32 = arith.constant 0 : i32
    %c0_i32_0 = arith.constant 0 : i32
    return %arg0, %c0_i32 : i32, i32
  }
}

</mosaic_0001>

<bundles_post_ra>
// kernel: tpu_custom_call.1
= control target key start
LH: loop header
LB: loop body
LE: loop exit
PB: predicated region body
PF: predicated region fallthrough
CT: control target
= control target key end

     0   :  { %8 = vsyncpa [#allocation3], 0  ;;  %s653_s0 = inlined_call_operand.hbm [shape: bf16[2,512], index: 0, kind: input, shape index: {}]   ;;  %s654_s1 = inlined_call_operand.hbm [shape: bf16[512,128], index: 1, kind: input, shape index: {}]   ;;  %s655_s2 = inlined_call_operand.vmem [shape: f32[1,128], index: 2, kind: input, shape index: {}]   ;;  %s656_s3 = inlined_call_operand.hbm [shape: f32[2,128], index: 3, kind: output, shape index: {}]  }
   0x1   :  { %9 = vsyncpa [#allocation6], 0 }
   0x2   :  { %10 = vsyncpa [#allocation4], 0  ;;  %s615_s12 = smov [#allocation2]   ;;  %s616_s14 = smov [#allocation5]  }
   0x3   :  { %s17_s13 = sshll.u32 %s615_s12, 4  ;;  %s26_s15 = sshll.u32 %s616_s14, 4  ;;  %s18_s13 = int_to_ptr.vmem [resolvable:$true] %s17_s13  ;;  %s27_s15 = int_to_ptr.vmem [resolvable:$true] %s26_s15 }
   0x4   :  { %s557_s16 = scalar_lea.vmem %s18_s13, 64  ;;  %p562_p1 = scmp.lt.s32.totalorder %s18_s13, %s18_s13 }
   0x5   :  { %p558_p0 = scmp.ne.s32.totalorder %s18_s13, %s557_s16  ;;  %p563_p2 = scmp.lt.s32.totalorder %s557_s16, %s557_s16 }
   0x7   :  { %p564_p3 = por %p563_p2, %p562_p1 }
   0x9   :  { %p565_p4 = pnand %p564_p3, %p558_p0 }
   0xb   :  { %568 = shalt.err (!%p565_p4)
}
   0xc   :  { %20 = dma.hbm_to_vmem [thread:$0]  %s653_s0, 64, %s18_s13, [#allocation3]  }
   0xd   :  { %s577_s19 = scalar_lea.vmem %s27_s15, 4096  ;;  %p582_p6 = scmp.lt.s32.totalorder %s27_s15, %s27_s15 }
   0xe   :  { %p578_p5 = scmp.ne.s32.totalorder %s27_s15, %s577_s19  ;;  %p583_p7 = scmp.lt.s32.totalorder %s577_s19, %s577_s19 }
  0x10   :  { %p584_p8 = por %p583_p7, %p582_p6 }
  0x12   :  { %p585_p9 = pnand %p584_p8, %p578_p5 }
  0x14   :  { %588 = shalt.err (!%p585_p9)
}
  0x15   :  { %s617_s20 = smov 64   ;;  %s618_s21 = smov 4  }
  0x16   :  { %32 = dma.hbm_to_vmem [thread:$0]  %s654_s1, 4096, %s27_s15, [#allocation6], %s617_s20, %s617_s20, %s618_s21  }
  0x17   :  { %609 = dma.done.wait [#allocation3], 64  }
  0x18   :  { %610 = vsyncadd [#allocation3], 4294967232 }
  0x19   :  { %611 = dma.done.wait [#allocation6], 4096  }
  0x1a   :  { %612 = vsyncadd [#allocation6], 4294963200  ;;  %v517_v0 = vld [vmem:[#allocation5 + $0x78] sm:$0xff]   ;;  %v521_v4 = vld [vmem:[#allocation5 + $0x70] sm:$0xff]   ;;  %v619_v22 = vmov 1966171168   ;;  %v126_v24 = vlaneseq }
  0x1b   :  { %v518_v1 = vld [vmem:[#allocation5 + $0xf8] sm:$0xff]   ;;  %467 = vmatprep.subr.bf16.mxu0 %v517_v0  ;;  %v522_v5 = vld [vmem:[#allocation5 + $0xf0] sm:$0xff]   ;;  %v525_v8 = vld [vmem:[#allocation5 + $0x68] sm:$0xff]   ;;  %v124_v23 = vunpack.c.l.s4 %v619_v22  ;;  %s620_s24 = smov [#allocation7]  }
  0x1c   :  { %v519_v2 = vld [vmem:[#allocation5 + $0x38] sm:$0xff]   ;;  %489 = vmatprep.subr.bf16.mxu1 %v518_v1  ;;  %v523_v6 = vld [vmem:[#allocation5 + $0x30] sm:$0xff]   ;;  %v526_v9 = vld [vmem:[#allocation5 + $0xe8] sm:$0xff]   ;;  %v127_v30 = vshrl.u32 %v126_v24, 7  ;;  %s423_s25 = sshll.u32 %s620_s24, 4  ;;  %s424_s25 = int_to_ptr.vmem [resolvable:$true] %s423_s25 }
  0x1d   :  { %v520_v3 = vld [vmem:[#allocation5 + $0xb8] sm:$0xff]   ;;  %468 = vmatpush3.bf16.msra.mxu0 %v519_v2  ;;  %v524_v7 = vld [vmem:[#allocation5 + $0xb0] sm:$0xff]   ;;  %v527_v10 = vld [vmem:[#allocation5 + $0x28] sm:$0xff]   ;;  %v125_v29 = vunpack.c.0.s8 %v124_v23  ;;  %s589_s26 = scalar_lea.vmem %s424_s25, 32  ;;  %p594_p11 = scmp.lt.s32.totalorder %s424_s25, %s424_s25 }
  0x1e   :  { %490 = vmatpush3.bf16.msra.mxu1 %v520_v3  ;;  %469 = vmatprep.subr.bf16.mxu0 %v521_v4  ;;  %v528_v11 = vld [vmem:[#allocation5 + $0xa8] sm:$0xff]   ;;  %v529_v12 = vld [vmem:[#allocation5 + $0x60] sm:$0xff]   ;;  %v533_v16 = vld [vmem:[#allocation5 + $0x58] sm:$0xff]   ;;  %p590_p10 = scmp.ne.s32.totalorder %s424_s25, %s589_s26  ;;  %p595_p12 = scmp.lt.s32.totalorder %s589_s26, %s589_s26 }
  0x1f   :  { %491 = vmatprep.subr.bf16.mxu1 %v522_v5  ;;  %v530_v13 = vld [vmem:[#allocation5 + $0xe0] sm:$0xff]   ;;  %v534_v17 = vld [vmem:[#allocation5 + $0xd8] sm:$0xff]   ;;  %v537_v20 = vld [vmem:[#allocation5 + $0x50] sm:$0xff]   ;;  %v128_v35 = vsub.s32 %v125_v29, %v127_v30 }
  0x20   :  { %v531_v14 = vld [vmem:[#allocation5 + $0x20] sm:$0xff]   ;;  %v535_v18 = vld [vmem:[#allocation5 + $0x18] sm:$0xff]   ;;  %v538_v21 = vld [vmem:[#allocation5 + $0xd0] sm:$0xff]   ;;  %p596_p13 = por %p595_p12, %p594_p11 }
  0x21   :  { %470 = vmatpush3.bf16.msra.mxu0 %v523_v6  ;;  %v532_v15 = vld [vmem:[#allocation5 + $0xa0] sm:$0xff]   ;;  %v536_v19 = vld [vmem:[#allocation5 + $0x98] sm:$0xff]   ;;  %v539_v25 = vld [vmem:[#allocation5 + $0x10] sm:$0xff]  }
  0x22   :  { %492 = vmatpush3.bf16.msra.mxu1 %v524_v7  ;;  %471 = vmatprep.subr.bf16.mxu0 %v525_v8  ;;  %v540_v26 = vld [vmem:[#allocation5 + $0x90] sm:$0xff]   ;;  %v541_v27 = vld [vmem:[#allocation5 + $0x48] sm:$0xff]   ;;  %v545_v33 = vld [vmem:[#allocation5 + $0x40] sm:$0xff]   ;;  %p597_p0 = pnand %p596_p13, %p590_p10 }
  0x23   :  { %493 = vmatprep.subr.bf16.mxu1 %v526_v9  ;;  %v542_v28 = vld [vmem:[#allocation5 + $0xc8] sm:$0xff]   ;;  %v546_v34 = vld [vmem:[#allocation5 + $0xc0] sm:$0xff]   ;;  %v434_v38 = vld.sshfl [vmem:[#allocation2] sm:$0x33 pattern:$0x75316420] }
  0x24   :  { %v543_v31 = vld [vmem:[#allocation5 + $0x8] sm:$0xff]   ;;  %v547_v36 = vld [vmem:[#allocation5] sm:$0xff]   ;;  %v122_v39 = vcombine.high %v434_v38, %v434_v38  ;;  %v129_v40 = vrot.slane %v434_v38, %v128_v35  ;;  %v433_v46 = vld [vmem:[%s655_s2] ss:$0 sm:$0xff] }
  0x25   :  { %472 = vmatpush3.bf16.msra.mxu0 %v527_v10  ;;  %v544_v32 = vld [vmem:[#allocation5 + $0x88] sm:$0xff]   ;;  %v548_v37 = vld [vmem:[#allocation5 + $0x80] sm:$0xff]  }
  0x26   :  { %494 = vmatpush3.bf16.msra.mxu1 %v528_v11  ;;  %473 = vmatprep.subr.bf16.mxu0 %v529_v12  ;;  %v136_v41 = vrot.slane %v122_v39, %v128_v35  ;;  %v137_v42 = vcombine.high %v129_v40, %v129_v40 }
  0x27   :  { %495 = vmatprep.subr.bf16.mxu1 %v530_v13 }
  0x28   :  { %367 = vmatprep.mubr.bf16.mxu0 %v136_v41  ;;  %v138_v43 = vcombine.high %v136_v41, %v136_v41 }
  0x29   :  { %474 = vmatpush3.bf16.msra.mxu0 %v531_v14 }
  0x2a   :  { %496 = vmatpush3.bf16.msra.mxu1 %v532_v15  ;;  %475 = vmatprep.subr.bf16.mxu0 %v533_v16 }
  0x2b   :  { %497 = vmatprep.subr.bf16.mxu1 %v534_v17  ;;  %407 = vmatprep.mubr.bf16.mxu1 %v138_v43 }
  0x2d   :  { %476 = vmatpush3.bf16.msra.mxu0 %v535_v18 }
  0x2e   :  { %498 = vmatpush3.bf16.msra.mxu1 %v536_v19  ;;  %477 = vmatprep.subr.bf16.mxu0 %v537_v20 }
  0x2f   :  { %499 = vmatprep.subr.bf16.mxu1 %v538_v21 }
  0x31   :  { %478 = vmatpush3.bf16.msra.mxu0 %v539_v25 }
  0x32   :  { %500 = vmatpush3.bf16.msra.mxu1 %v540_v26  ;;  %479 = vmatprep.subr.bf16.mxu0 %v541_v27 }
  0x33   :  { %501 = vmatprep.subr.bf16.mxu1 %v542_v28 }
  0x35   :  { %480 = vmatpush3.bf16.msra.mxu0 %v543_v31 }
  0x36   :  { %502 = vmatpush3.bf16.msra.mxu1 %v544_v32  ;;  %481 = vmatprep.subr.bf16.mxu0 %v545_v33 }
  0x37   :  { %503 = vmatprep.subr.bf16.mxu1 %v546_v34 }
  0x39   :  { %482 = vmatpush3.bf16.msra.mxu0 %v547_v36 }
  0x3a   :  { %504 = vmatpush3.bf16.msra.mxu1 %v548_v37 }
  0x3c   :  { %368 = vmatmul.mubr.bf16.vlgmr.msra.gmra.mxu0 %v129_v40 }
  0x3d   :  { %408 = vmatmul.mubr.bf16.vlgmr.msra.gmra.mxu1 %v137_v42 }
  0xfc   :  { %v483_v44 = vpop.f32.mrf.mxu0 }
  0xfd   :  { %v505_v45 = vpop.f32.mrf.mxu1 }
  0xfe   :  { %v484_v47 = vpop.f32.mrf.mxu0 }
  0xff   :  { %v485_v48 = vadd.f32 %v484_v47, %v483_v44  ;;  %v506_v49 = vpop.f32.mrf.mxu1 }
 0x100   :  { %v486_v50 = vpop.f32.mrf.mxu0  ;;  %v507_v52 = vadd.f32 %v506_v49, %v505_v45 }
 0x101   :  { %v370_v51 = vadd.f32 %v485_v48, %v433_v46  ;;  %v508_v53 = vpop.f32.mrf.mxu1 }
 0x102   :  { %v487_v54 = vpop.f32.mrf.mxu0 }
 0x103   :  { %v410_v55 = vadd.f32 %v507_v52, %v370_v51  ;;  %v509_v56 = vpop.f32.mrf.mxu1 }
 0x105   :  { %v415_v57 = vmax.f32 %v410_v55, 0.0 }
 0x107   :  { %416 = vst [vmem:[#allocation7] sm:$0x3] %v415_v57 }
 0x108   :  { %600 = shalt.err (!%p597_p0)
}
 0x109   :  { %426 = dma.vmem_to_hbm [thread:$0]  %s424_s25, 32, %s656_s3, [#allocation4]  }
 0x10a   :  { %613 = dma.done.wait [#allocation4], 32  }
 0x10b   :  { %614 = vsyncadd [#allocation4], 4294967264 }
 0x10c   :  { %430 = vsyncpa [#allocation3], 1 }
 0x10d   :  { %431 = vsyncpa [#allocation6], 1 }
 0x10e   :  { %432 = vsyncpa [#allocation4], 1 }

</bundles_post_ra>
